<compile_context>
chip_gen: v5e
topology: v5e:2x2
jax: 0.10.0
libtpu: 0.0.40
codegen_flags: <defaults>
</compile_context>

<pallas_src>
import functools

import jax
import jax.numpy as jnp
from jax import lax
from jax.experimental import pallas as pl
from jax.experimental.pallas import tpu as pltpu


def _round_up(x, m):
    return (x + m - 1) // m * m


# ---------------------------------------------------------------------------
# Pallas kernel: one fused matmul + masked full-width nonlinearities
# ---------------------------------------------------------------------------
def _heads_kernel(x_ref, w_ref, b_ref, out_ref, *, G, Hh, tem_softmax, corr_limit):
    # x_ref: (TM, H) f32, w_ref: (H, OUT_W) bf16, b_ref: (1, OUT_W) f32,
    # out_ref: (TM, OUT_W) f32, OUT_W = 6G + Hh.
    # Column layout: [mean_x | mean_y | std_x | std_y | corr | pi | heading].
    z = jnp.dot(x_ref[...].astype(jnp.bfloat16), w_ref[...],
                preferred_element_type=jnp.float32) + b_ref[...]

    lane = lax.broadcasted_iota(jnp.int32, z.shape, 1)
    is_std = (lane >= 2 * G) & (lane < 4 * G)
    is_corr = (lane >= 4 * G) & (lane < 5 * G)
    is_pi = (lane >= 5 * G) & (lane < 6 * G)

    # Full-vreg-width transcendentals (EUP slot, width is free); select per lane.
    sp = jnp.minimum(jax.nn.softplus(z) + 0.001, 0.5)
    th = jnp.tanh(z) * corr_limit

    # pi softmax over the G mixture lanes, done as masked full-width max/sum.
    p = jnp.where(is_pi, z * (1.0 / tem_softmax), -jnp.inf)
    p = p - jnp.max(p, axis=-1, keepdims=True)
    e = jnp.where(is_pi, jnp.exp(p), 0.0)
    pi = e / jnp.sum(e, axis=-1, keepdims=True)   # exact divide: rows sum to 1

    out = jnp.where(is_std, sp, z)                # mean/heading lanes pass through
    out = jnp.where(is_corr, th, out)
    out = jnp.where(is_pi, pi, out)
    out_ref[...] = out


# ---------------------------------------------------------------------------
# One-time parameter packing (hoisted out of the per-call hot path)
# ---------------------------------------------------------------------------
def pack_params(params, *, n_gaussian, output_dim):
    """Transpose, de-interleave and concatenate all head weights once."""
    assert output_dim == 4, "PredictionsHeads reshape implies output_dim == 4"
    G = n_gaussian
    Hh = output_dim // 2
    H = params["w_mean"].shape[1]

    # PyTorch Linear: y = x @ W.T + b, W is (out_features, in_features).
    w_mean_t = params["w_mean"].T.astype(jnp.float32)   # (H, 2G), cols [g0x,g0y,...]
    w_std_t = params["w_std"].T.astype(jnp.float32)

    w_cols = jnp.concatenate([
        w_mean_t[:, 0::2], w_mean_t[:, 1::2],            # mean_x | mean_y
        w_std_t[:, 0::2], w_std_t[:, 1::2],              # std_x  | std_y
        params["w_corr"].T.astype(jnp.float32),          # corr
        params["w_pi"].T.astype(jnp.float32),            # pi
        params["w_heading"].T.astype(jnp.float32),       # heading
    ], axis=1)                                           # (H, 6G+Hh)
    b_cols = jnp.concatenate([
        params["b_mean"][0::2], params["b_mean"][1::2],
        params["b_std"][0::2], params["b_std"][1::2],
        params["b_corr"], params["b_pi"], params["b_heading"],
    ], axis=0).astype(jnp.float32)                       # (6G+Hh,)

    return {"w_packed": w_cols.astype(jnp.bfloat16),     # (H, 6G+Hh) bf16
            "b_packed": b_cols[None, :],                 # (1, 6G+Hh) f32
            "h_dim": H}


# ---------------------------------------------------------------------------
# Forward wrapper (tiling, pallas_call, output unpacking)
# ---------------------------------------------------------------------------
@functools.partial(jax.jit, static_argnames=(
    "n_gaussian", "output_dim", "tem_softmax", "corr_limit", "tm"))
def predictions_heads_forward(x, packed, *, n_gaussian, output_dim,
                              tem_softmax=1.3, corr_limit=0.99, tm=1024):
    assert output_dim == 4, "PredictionsHeads reshape implies output_dim == 4"
    B, N, H = x.shape
    G = n_gaussian
    Hh = output_dim // 2
    OUT_W = 6 * G + Hh
    M = B * N

    # Row-tile sizing:
    #  * double-buffered working set (2x f32 x-tile + 2x f32 out-tile) kept
    #    under ~10 MiB so it fits v5e's 16 MiB default scoped VMEM (and v7x 32 MiB),
    #  * at least 4 grid steps when M allows so v7x can shard across its 2 TCs.
    bytes_per_row = 2 * H * 4 + 2 * OUT_W * 4
    tm_vmem = max(8, (10 * 1024 * 1024 // bytes_per_row) // 8 * 8)
    tm_grid = _round_up(pl.cdiv(M, 4), 8)
    TM = max(8, min(tm, tm_vmem, tm_grid))
    grid = (pl.cdiv(M, TM),)   # partial trailing block handled by Pallas masking

    xm = x.reshape(M, H)                 # metadata-only reshape, no cast, no pad
    w = packed["w_packed"]               # (H, OUT_W) bf16, resident
    b = packed["b_packed"]               # (1, OUT_W) f32, resident

    kernel = functools.partial(_heads_kernel, G=G, Hh=Hh,
                               tem_softmax=float(tem_softmax),
                               corr_limit=float(corr_limit))
    cost = pl.CostEstimate(
        flops=2 * M * H * OUT_W,
        transcendentals=4 * M * OUT_W,
        bytes_accessed=M * H * 4 + M * OUT_W * 4 + H * OUT_W * 2 + OUT_W * 4,
    )

    slab = pl.pallas_call(
        kernel,
        out_shape=jax.ShapeDtypeStruct((M, OUT_W), jnp.float32),
        grid=grid,
        in_specs=[
            pl.BlockSpec((TM, H), lambda i: (i, 0)),        # x tile (pipelined, f32)
            pl.BlockSpec((H, OUT_W), lambda i: (0, 0)),     # packed weight (resident)
            pl.BlockSpec((1, OUT_W), lambda i: (0, 0)),     # packed bias (resident)
        ],
        out_specs=pl.BlockSpec((TM, OUT_W), lambda i: (i, 0)),
        compiler_params=pltpu.CompilerParams(
            dimension_semantics=("parallel",)),
        cost_estimate=cost,
    )(xm, w, b)

    # Cheap JAX glue: split the narrow f32 slab into the module's output tuple.
    mean_x = slab[:, 0:G]
    mean_y = slab[:, G:2 * G]
    std_x = slab[:, 2 * G:3 * G]
    std_y = slab[:, 3 * G:4 * G]
    corr = slab[:, 4 * G:5 * G]
    pi = slab[:, 5 * G:6 * G]
    heading = slab[:, 6 * G:6 * G + Hh]

    out_mean = jnp.stack([mean_x, mean_y], axis=-1).reshape(B, N, G, 2)
    out_std = jnp.stack([std_x, std_y], axis=-1).reshape(B, N, G, 2)
    out_corr = corr.reshape(B, N, G)
    out_heading = heading.reshape(B, N, Hh)
    out_pi = pi.reshape(B, N, G)
    # Cholesky rows recomputed here on tiny (M, G) arrays (dropped from the slab).
    row1 = jnp.stack([std_x, jnp.zeros_like(std_x)], axis=-1)                 # (M,G,2)
    row2 = jnp.stack([corr * std_y, jnp.sqrt(1.0 - corr ** 2) * std_y], axis=-1)
    out_L = jnp.stack([row1, row2], axis=-2).reshape(B, N, G, 2, 2)
    return out_mean, out_std, out_corr, out_heading, out_pi, out_L


# ---------------------------------------------------------------------------
# Pure-JAX reference (mirrors the PyTorch forward exactly, full f32)
# ---------------------------------------------------------------------------
def predictions_heads_reference(x, params, *, n_gaussian, output_dim,
                                tem_softmax=1.3, corr_limit=0.99):
    B, N, H = x.shape
    G = n_gaussian

    def lin(w, b):
        return jnp.einsum("bnh,oh->bno", x, w) + b

    out_mean = lin(params["w_mean"], params["b_mean"])
    out_std_raw = lin(params["w_std"], params["b_std"])
    out_corr_raw = lin(params["w_corr"], params["b_corr"])
    out_pi_raw = lin(params["w_pi"], params["b_pi"])
    out_heading = lin(params["w_heading"], params["b_heading"])

    out_pi = jax.nn.softmax(out_pi_raw / tem_softmax, axis=-1)
    out_corr = jnp.tanh(out_corr_raw) * corr_limit
    out_std = jnp.minimum(jax.nn.softplus(out_std_raw) + 0.001, 0.5)

    out_mean = out_mean.reshape(B, N, G, 2)
    out_std = out_std.reshape(B, N, G, 2)
    std_x = out_std[..., 0]
    std_y = out_std[..., 1]
    row1 = jnp.stack([std_x, jnp.zeros_like(std_x)], axis=-1)
    row2 = jnp.stack([out_corr * std_y, jnp.sqrt(1.0 - out_corr ** 2) * std_y], axis=-1)
    out_L = jnp.stack([row1, row2], axis=-2)
    return out_mean, out_std, out_corr, out_heading, out_pi, out_L


# ---------------------------------------------------------------------------
# Deterministic parameter init + smoke test
# ---------------------------------------------------------------------------
def init_params(key, h_dim, output_dim, n_gaussian):
    G = n_gaussian
    head_out = int(output_dim * G / 2)   # mean / std heads
    heading_out = int(output_dim / 2)
    keys = jax.random.split(key, 10)
    scale = 0.1

    def w(k, out_f):
        return scale * jax.random.normal(k, (out_f, h_dim), dtype=jnp.float32)

    def b(k, out_f):
        return scale * jax.random.normal(k, (out_f,), dtype=jnp.float32)

    return {
        "w_mean": w(keys[0], head_out),       "b_mean": b(keys[1], head_out),
        "w_std": w(keys[2], head_out),        "b_std": b(keys[3], head_out),
        "w_corr": w(keys[4], G),              "b_corr": b(keys[5], G),
        "w_heading": w(keys[6], heading_out), "b_heading": b(keys[7], heading_out),
        "w_pi": w(keys[8], G),                "b_pi": b(keys[9], G),
    }


if __name__ == "__main__":
    B, N, H = 2, 8, 32
    n_gaussian = 5
    output_dim = 4   # (x, y) mean + (x, y) std per gaussian

    key = jax.random.PRNGKey(0)
    k_x, k_p = jax.random.split(key)
    x = jax.random.normal(k_x, (B, N, H), dtype=jnp.float32)
    params = init_params(k_p, H, output_dim, n_gaussian)

    # One-time packing (outside the hot path).
    packed = pack_params(params, n_gaussian=n_gaussian, output_dim=output_dim)

    outs = predictions_heads_forward(x, packed, n_gaussian=n_gaussian,
                                     output_dim=output_dim)
    outs = jax.block_until_ready(outs)

    refs = predictions_heads_reference(x, params, n_gaussian=n_gaussian,
                                       output_dim=output_dim)
    names = ["out_mean", "out_std", "out_corr", "out_cos_sin_heading", "out_pi", "out_L"]
    # Tolerance loosened vs the pure-f32 reference because the kernel feeds the MXU
    # with bf16 x / weights (flag this if exact f32 parity with PyTorch is required).
    for name, got, ref in zip(names, outs, refs):
        assert got.shape == ref.shape, (name, got.shape, ref.shape)
        assert jnp.allclose(got, ref, atol=2e-2, rtol=2e-2), f"mismatch in {name}"

    print("KERNEL_OK")
</pallas_src>

<mosaic_0001>
module attributes {stable_mosaic.version = 11 : i64} {
  func.func @_heads_kernel(%arg0: i32, %arg1: memref<8x32xf32, #tpu.memory_space<vmem>>, %arg2: memref<32x32xbf16, #tpu.memory_space<vmem>>, %arg3: memref<1x32xf32, #tpu.memory_space<vmem>>, %arg4: memref<8x32xf32, #tpu.memory_space<vmem>>) attributes {dimension_semantics = [#tpu.dimension_semantics<parallel>], iteration_bounds = array<i64: 2>, scalar_prefetch = 0 : i64, scratch_operands = 0 : i64, tpu.core_type = #tpu.core_type<tc>, window_params = [{transform_indices = @transform_0, window_bounds = array<i64: 8, 32>}, {pipeline_mode = #tpu.pipeline_mode<synchronous>, transform_indices = @transform_1, window_bounds = array<i64: 32, 32>}, {pipeline_mode = #tpu.pipeline_mode<synchronous>, transform_indices = @transform_2, window_bounds = array<i64: 1, 32>}, {transform_indices = @transform_3, window_bounds = array<i64: 8, 32>}]} {
    %c0 = arith.constant 0 : index
    %c0_0 = arith.constant 0 : index
    %0 = vector.load %arg1[%c0, %c0_0] : memref<8x32xf32, #tpu.memory_space<vmem>>, vector<8x32xf32>
    %1 = arith.truncf %0 : vector<8x32xf32> to vector<8x32xbf16>
    %c0_1 = arith.constant 0 : index
    %c0_2 = arith.constant 0 : index
    %2 = vector.load %arg2[%c0_1, %c0_2] : memref<32x32xbf16, #tpu.memory_space<vmem>>, vector<32x32xbf16>
    %cst = arith.constant dense<0.000000e+00> : vector<8x32xf32>
    %3 = tpu.matmul %1, %2, %cst {dimension_numbers = #tpu.dot_dimension_numbers<[1], [0], [0], [1], [0, 0, 1, 1], [], []>} : vector<8x32xbf16>, vector<32x32xbf16>, vector<8x32xf32> -> vector<8x32xf32>
    %c0_3 = arith.constant 0 : index
    %c0_4 = arith.constant 0 : index
    %4 = vector.load %arg3[%c0_3, %c0_4] : memref<1x32xf32, #tpu.memory_space<vmem>>, vector<1x32xf32>
    %5 = vector.broadcast %4 : vector<1x32xf32> to vector<8x32xf32>
    %6 = arith.addf %3, %5 : vector<8x32xf32>
    %7 = tpu.iota {dimensions = array<i32: 1>} : vector<8x32xi32>
    %c10_i32 = arith.constant 10 : i32
    %8 = vector.broadcast %c10_i32 : i32 to vector<8x32xi32>
    %9 = arith.cmpi sge, %7, %8 : vector<8x32xi32>
    %c20_i32 = arith.constant 20 : i32
    %10 = vector.broadcast %c20_i32 : i32 to vector<8x32xi32>
    %11 = arith.cmpi slt, %7, %10 : vector<8x32xi32>
    %12 = arith.andi %9, %11 : vector<8x32xi1>
    %c20_i32_5 = arith.constant 20 : i32
    %13 = vector.broadcast %c20_i32_5 : i32 to vector<8x32xi32>
    %14 = arith.cmpi sge, %7, %13 : vector<8x32xi32>
    %c25_i32 = arith.constant 25 : i32
    %15 = vector.broadcast %c25_i32 : i32 to vector<8x32xi32>
    %16 = arith.cmpi slt, %7, %15 : vector<8x32xi32>
    %17 = arith.andi %14, %16 : vector<8x32xi1>
    %c25_i32_6 = arith.constant 25 : i32
    %18 = vector.broadcast %c25_i32_6 : i32 to vector<8x32xi32>
    %19 = arith.cmpi sge, %7, %18 : vector<8x32xi32>
    %c30_i32 = arith.constant 30 : i32
    %20 = vector.broadcast %c30_i32 : i32 to vector<8x32xi32>
    %21 = arith.cmpi slt, %7, %20 : vector<8x32xi32>
    %22 = arith.andi %19, %21 : vector<8x32xi1>
    %cst_7 = arith.constant 0.000000e+00 : f32
    %23 = vector.broadcast %cst_7 : f32 to vector<8x32xf32>
    %24 = arith.maximumf %6, %23 : vector<8x32xf32>
    %25 = vector.broadcast %cst_7 : f32 to vector<8x32xf32>
    %26 = arith.subf %6, %25 : vector<8x32xf32>
    %27 = arith.cmpf one, %26, %26 : vector<8x32xf32>
    %28 = vector.broadcast %cst_7 : f32 to vector<8x32xf32>
    %29 = arith.addf %6, %28 : vector<8x32xf32>
    %30 = math.absf %26 : vector<8x32xf32>
    %cst_8 = arith.constant 0.000000e+00 : f32
    %31 = vector.broadcast %cst_8 : f32 to vector<8x32xf32>
    %32 = arith.subf %31, %30 : vector<8x32xf32>
    %33 = math.exp %32 : vector<8x32xf32>
    %34 = math.log1p %33 : vector<8x32xf32>
    %35 = arith.addf %24, %34 : vector<8x32xf32>
    %36 = arith.select %27, %29, %35 : vector<8x32xi1>, vector<8x32xf32>
    %cst_9 = arith.constant 1.000000e-03 : f32
    %37 = vector.broadcast %cst_9 : f32 to vector<8x32xf32>
    %38 = arith.addf %36, %37 : vector<8x32xf32>
    %cst_10 = arith.constant 5.000000e-01 : f32
    %39 = vector.broadcast %cst_10 : f32 to vector<8x32xf32>
    %40 = arith.minimumf %38, %39 : vector<8x32xf32>
    %41 = math.tanh %6 : vector<8x32xf32>
    %cst_11 = arith.constant 9.900000e-01 : f32
    %42 = vector.broadcast %cst_11 : f32 to vector<8x32xf32>
    %43 = arith.mulf %41, %42 : vector<8x32xf32>
    %cst_12 = arith.constant 0.769230782 : f32
    %44 = vector.broadcast %cst_12 : f32 to vector<8x32xf32>
    %45 = arith.mulf %6, %44 : vector<8x32xf32>
    %cst_13 = arith.constant 0xFF800000 : f32
    %46 = vector.broadcast %cst_13 : f32 to vector<8x32xf32>
    %47 = arith.select %22, %45, %46 : vector<8x32xi1>, vector<8x32xf32>
    %cst_14 = arith.constant dense<0xFF800000> : vector<8xf32>
    %48 = vector.multi_reduction <maximumf>, %47, %cst_14 [1] : vector<8x32xf32> to vector<8xf32>
    %49 = vector.shape_cast %48 : vector<8xf32> to vector<8x1xf32>
    %50 = vector.broadcast %49 : vector<8x1xf32> to vector<8x32xf32>
    %51 = arith.subf %47, %50 : vector<8x32xf32>
    %52 = math.exp %51 : vector<8x32xf32>
    %cst_15 = arith.constant 0.000000e+00 : f32
    %53 = vector.broadcast %cst_15 : f32 to vector<8x32xf32>
    %54 = arith.select %22, %52, %53 : vector<8x32xi1>, vector<8x32xf32>
    %cst_16 = arith.constant dense<0.000000e+00> : vector<8xf32>
    %55 = vector.multi_reduction <add>, %54, %cst_16 [1] : vector<8x32xf32> to vector<8xf32>
    %56 = vector.shape_cast %55 : vector<8xf32> to vector<8x1xf32>
    %57 = vector.broadcast %56 : vector<8x1xf32> to vector<8x32xf32>
    %58 = arith.divf %54, %57 : vector<8x32xf32>
    %59 = arith.select %12, %40, %6 : vector<8x32xi1>, vector<8x32xf32>
    %60 = arith.select %17, %43, %59 : vector<8x32xi1>, vector<8x32xf32>
    %61 = arith.select %22, %58, %60 : vector<8x32xi1>, vector<8x32xf32>
    %c0_17 = arith.constant 0 : index
    %c0_18 = arith.constant 0 : index
    %62 = vector.load %arg4[%c0_17, %c0_18] : memref<8x32xf32, #tpu.memory_space<vmem>>, vector<8x32xf32>
    tpu.vector_store %arg4[%c0_17, %c0_18], %61 {strides = array<i32>} : memref<8x32xf32, #tpu.memory_space<vmem>>, vector<8x32xf32>,
    return
  }
  func.func @transform_0(%arg0: i32) -> (i32, i32) {
    %c0_i32 = arith.constant 0 : i32
    %c0_i32_0 = arith.constant 0 : i32
    return %arg0, %c0_i32 : i32, i32
  }
  func.func @transform_1(%arg0: i32) -> (i32, i32) {
    %c0_i32 = arith.constant 0 : i32
    %c0_i32_0 = arith.constant 0 : i32
    %c0_i32_1 = arith.constant 0 : i32
    return %c0_i32, %c0_i32_0 : i32, i32
  }
  func.func @transform_2(%arg0: i32) -> (i32, i32) {
    %c0_i32 = arith.constant 0 : i32
    %c0_i32_0 = arith.constant 0 : i32
    %c0_i32_1 = arith.constant 0 : i32
    return %c0_i32, %c0_i32_0 : i32, i32
  }
  func.func @transform_3(%arg0: i32) -> (i32, i32) {
    %c0_i32 = arith.constant 0 : i32
    %c0_i32_0 = arith.constant 0 : i32
    return %arg0, %c0_i32 : i32, i32
  }
}

</mosaic_0001>

<bundles_post_ra>
// kernel: predictions_heads_forward.1
= control target key start
LH: loop header
LB: loop body
LE: loop exit
PB: predicated region body
PF: predicated region fallthrough
CT: control target
= control target key end

     0   :  { %8 = vsyncpa [#allocation3], 0  ;;  %s788_s0 = inlined_call_operand.hbm [shape: f32[16,32], index: 0, kind: input, shape index: {}]   ;;  %s789_s1 = inlined_call_operand.hbm [shape: bf16[32,32], index: 1, kind: input, shape index: {}]   ;;  %s790_s2 = inlined_call_operand.hbm [shape: f32[1,32], index: 2, kind: input, shape index: {}]   ;;  %s791_s3 = inlined_call_operand.vmem [shape: f32[16,32], index: 3, kind: output, shape index: {}]  }
   0x1   :  { %10 = vsyncpa [#allocation3 + $0x1], 0 }
   0x2   :  { %11 = vsyncpa [#allocation5], 0  ;;  %s659_s12 = smov 0   ;;  %s661_s13 = smov 0  }
   0x3   :  { %s663_s14 = smov 0   ;;  %s665_s15 = smov 0  }
   0x4 LB: > { %s127_s18 = sshll.u32 %s789_s1, 4  ;;  %s683_s19 = sadd.s32 4294967295, %s633_s15   ;;  %s633_s15 = sphi %s665_s15, %s802_s15   ;;  %s629_s14 = sphi %s663_s14, %s801_s14   ;;  %s625_s13 = sphi %s661_s13, %s800_s13   ;;  %s621_s12 = sphi %s659_s12, %s799_s12   ;;  %s128_s18 = int_to_ptr.hbm [resolvable:$true] %s127_s18 }
   0x5   : > { %p408_p0 = scmp.ge.s32.totalorder %s633_s15, 1  ;;  %p38_p1 = scmp.eq.s32.totalorder %s683_s19, 0 }
   0x6   : > { %p116_p2 = scmp.lt.s32.totalorder %s633_s15, 3  ;;  %s635_s21 = smov [#allocation4]  }
   0x7   : > { %s129_s22 = sshll.u32 %s635_s21, 4  ;;  %s142_s25 = sshll.u32 %s790_s2, 4  ;;  %s130_s22 = int_to_ptr.vmem [resolvable:$true] %s129_s22  ;;  %s143_s25 = int_to_ptr.hbm [resolvable:$true] %s142_s25 }
   0x8   : > { %p688_p3 = pnand %p408_p0, %p116_p2  ;;  %s636_s26 = smov [#allocation6]  }
   0x9   : > { %s144_s27 = sshll.u32 %s636_s26, 4  ;;  %s637_s28 = smov 64   ;;  %s145_s27 = int_to_ptr.vmem [resolvable:$true] %s144_s27 }
   0xa   : > { %p442_p4 = pneg %p688_p3  ;;  %s638_s29 = smov 4  }
   0xb   : > { %s700_s30 = sadd.s32 1, %s633_s15   ;;  %s24_s5 = sadd.s32 1, %s629_s14 }
   0xc   : > { %p443_p5 = pnand %p442_p4, %p38_p1  ;;  %s21_s4 = ssub.s32 %s633_s15, %s700_s30 }
   0xd   : > { %p22_p6 = scmp.eq.s32.totalorder %s21_s4, 0  ;;  %p31_p7 = scmp.ne.s32.totalorder %s629_s14, %s625_s13 }
   0xe   : > { %445 = dma.hbm_to_vmem [thread:$0]  (!%p443_p5), %s128_s18, 256, %s130_s22, [#allocation5], %s637_s28, %s637_s28, %s638_s29  }
   0xf   : > { %448 = dma.hbm_to_vmem [thread:$0]  (!%p443_p5), %s143_s25, 16, %s145_s27, [#allocation5]  }
  0x10   : > { %p32_p8 = scmp.eq.s32.totalorder %s633_s15, 0  ;;  %p37_p9 = scmp.ne.s32.totalorder %s625_s13, %s621_s12 }
  0x11   : > { %s711_s6 = scalar_select %p22_p6, %s629_s14, %s24_s5  }
  0x12   : > { %p715_p10 = por %p38_p1, %p37_p9  ;;  %p455_p11 = scmp.lt.s32.totalorder %s633_s15, 2 }
  0x13   : > { %s155_s8 = sand.u32 1, %s629_s14   ;;  %s413_s9 = sshll.u32 %s633_s15, 3 }
  0x14   : > { %p33_p12 = por %p32_p8, %p31_p7  ;;  %s412_s10 = sshll.u32 %s155_s8, 3 }
  0x15   : > { %s163_s17 = scalar_lea.hbm %s788_s0, %s413_s9  ;;  %s159_s21 = scalar_lea.vmem [#allocation2], %s412_s10 }
  0x16   : > { %s165_s18 = sshll.u32 %s163_s17, 4  ;;  %s167_s22 = sshll.u32 %s159_s21, 4  ;;  %s166_s18 = int_to_ptr.hbm [resolvable:$true] %s165_s18  ;;  %s168_s22 = int_to_ptr.vmem [resolvable:$true] %s167_s22 }
  0x17   : > { %p725_p13 = pnand %p455_p11, %p33_p12  ;;  %s156_s23 = scalar_lea.sflag [#allocation3], %s155_s8 }
  0x18   : > { %s565_s24 = sshra.s32 %s166_s18, 4  ;;  %s572_s27 = scalar_lea.hbm %s788_s0, 16  ;;  %s566_s24 = int_to_ptr.hbm [resolvable:$true] %s565_s24 }
  0x19   : > { %s567_s15 = scalar_lea.hbm %s566_s24, 8  ;;  %p569_p2 = pneg %p725_p13 }
  0x1a   : > { %p568_p0 = scmp.ne.s32.totalorder %s566_s24, %s567_s15  ;;  %p573_p6 = scmp.lt.s32.totalorder %s566_s24, %s788_s0 }
  0x1b   : > { %p574_p7 = scmp.lt.s32.totalorder %s572_s27, %s567_s15 }
  0x1c   : > { %p570_p4 = pnand %p569_p2, %p568_p0 }
  0x1d   : > { %p575_p8 = por %p574_p7, %p573_p6 }
  0x1e   : > { %p571_p5 = pneg %p570_p4 }
  0x20   : > { %p576_p9 = pnand %p575_p8, %p571_p5 }
  0x22   : > { %579 = shalt.err (!%p576_p9)
}
  0x23   : > { %452 = dma.hbm_to_vmem [thread:$0]  (!%p725_p13), %s166_s18, 128, %s168_s22, %s156_s23  }
  0x24   : > { %176 = sbr.rel (%p688_p3) target bundleno = 450 (0x1c2), region = 32  ;;  %s178_s4 = sand.u32 (!%p688_p3), 1, %s625_s13  }
  0x25   : > { %s415_s5 = sshll.u32 (!%p688_p3), %s178_s4, 3  ;;  %s179_s8 = scalar_lea.sflag (!%p688_p3), [#allocation3], %s178_s4 }
  0x26   : > { %s182_s9 = scalar_lea.vmem (!%p688_p3), [#allocation2], %s415_s5 }
  0x29   : > { %612 = dma.done.wait (%p715_p10), %s179_s8, 128  }
  0x2a   : > { %614 = vsyncadd (%p715_p10), %s179_s8, 4294967168 }
  0x2b   : > { %616 = dma.done.wait (%p38_p1), [#allocation5], 272  }
  0x2c   : > { %618 = vsyncadd (%p38_p1), [#allocation5], 4294967024  ;;  %v431_v0 = vld [vmem:[#allocation4 + $0x8] sm:$0xff]  ;;  %v430_v1 = vld [vmem:[#allocation4] sm:$0xff]  ;;  %vm242_vm0 = vcmask 261120   ;;  %v259_v4 = vlaneseq  ;;  %p215_p1 = scmp.lt.s32.totalorder %s683_s19, 1 }
  0x2d   : > { %252 = vmatpush.bf16.msra.mxu0 %v431_v0  ;;  %v220_v2 = vld [vmem:[%s182_s9] sm:$0xff] }
  0x2e   : > { %v221_v3 = vpack.c.bf16 %v220_v2, %v220_v2  ;;  %v260_v5 = vand.u32 127, %v259_v4  ;;  %v494_v6 = vld [vmem:[#allocation6] ss:$0 sm:$0xff]  ;;  %s804_s19 = smov (!%p215_p1, %s683_s19), 1 }
  0x2f   : > { %s418_s20 = sshll.u32 %s804_s19, 3 }
  0x30   : > { %vm267_vm1 = vcmp.ge.s32.totalorder %v260_v5, 25  ;;  %vm268_vm2 = vcmp.lt.s32.totalorder %v260_v5, 30  ;;  %vm261_vm6 = vcmp.ge.s32.totalorder %v260_v5, 10  ;;  %vm262_vm7 = vcmp.lt.s32.totalorder %v260_v5, 20  ;;  %s218_s11 = scalar_lea.vmem %s791_s3, %s418_s20 }
  0x31   : > { %253 = vmatpush.bf16.msra.mxu0 %v430_v1  ;;  %vm751_vm3 = vmand %vm267_vm1, %vm268_vm2  ;;  %vm264_vm8 = vcmp.ge.s32.totalorder %v260_v5, 20  ;;  %vm265_vm9 = vcmp.lt.s32.totalorder %v260_v5, 25 }
  0x32   : > { %vm263_vm10 = vmand %vm261_vm6, %vm262_vm7 }
  0x33   : > { %vm758_vm11 = vmand %vm264_vm8, %vm265_vm9 }
  0x34   : > { %427 = vmatmul.msk.bf16.vlgmr.msra.gmra.mxu0 %vm242_vm0, %v221_v3 }
  0xb1   : > { %v255_v7 = vpop.f32.mrf.mxu0 }
  0xb2   : > { %v256_v8 = vadd.f32 %v494_v6, %v255_v7 }
  0xb4   : > { %v273_v10 = vand.u32 2147483647, %v256_v8  ;;  %v292_v11 = vmul.f32 0.7692308, %v256_v8  ;;  %v270_v25 = vmax.f32 %v256_v8, 0.0  ;;  %vm271_vm5 = vcmp.ne.f32.partialorder %v256_v8, %v256_v8 }
  0xb6   : > { %v274_v12 = vsub.f32 0.0, %v273_v10  ;;  %v293_v13 = vsel %vm751_vm3, %v292_v11, -inf }
  0xb7   : > { %v294_v14 = vsel %vm242_vm0, %v293_v13, -inf }
  0xb8   : > { %v275_v15 = vmul.f32 1.442695, %v274_v12  ;;  %295 = vmax.xlane.f32.xlu0 %v294_v14 }
  0xb9   : > { %v257_v16 = vpop.f32.mrf.mxu0 }
  0xba   : > { %495 = vpow2.f32 %v275_v15 }
  0xc0   : > { %v496_v17 = vpop.eup %495 }
  0xc1   : > { %v277_v18 = vadd.f32 1.0, %v496_v17  ;;  %v280_v19 = vmul.f32 -0.5, %v496_v17  ;;  %v283_v21 = vand.u32 2147483647, %v496_v17 }
  0xc3   : > { %497 = vlog2.f32 %v277_v18  ;;  %v281_v20 = vadd.f32 1.0, %v280_v19  ;;  %vm284_vm4 = vcmp.lt.f32.partialorder %v283_v21, 0.0004427343 }
  0xc4   : > { %499 = vtanh.f32 %v256_v8 }
  0xc5   : > { %v282_v24 = vmul.f32 %v496_v17, %v281_v20 }
  0xc9   : > { %v498_v22 = vpop.eup %497 }
  0xca   : > { %v279_v23 = vmul.f32 0.6931472, %v498_v22  ;;  %v500_v29 = vpop.eup %499 }
  0xcb   : > { %v291_v33 = vmul.f32 0.99, %v500_v29 }
  0xcc   : > { %v285_v26 = vsel %vm284_vm4, %v282_v24, %v279_v23 }
  0xcd   : > { %v286_v27 = vadd.f32 %v285_v26, %v270_v25 }
  0xcf   : > { %v287_v28 = vsel %vm271_vm5, %v256_v8, %v286_v27 }
  0xd0   : > { %v288_v30 = vadd.f32 0.001, %v287_v28 }
  0xd2   : > { %v289_v32 = vmin.f32 %v288_v30, 0.5 }
  0xd4   : > { %v319_v34 = vsel %vm263_vm10, %v289_v32, %v256_v8 }
  0xd5   : > { %v320_v35 = vsel %vm758_vm11, %v291_v33, %v319_v34 }
 0x12b   : > { %v296_v36 = vpop.xlane.xlu0 %295 }
 0x12c   : > { %v297_v37 = vsub.f32 %v293_v13, %v296_v36 }
 0x12e   : > { %v298_v38 = vmul.f32 1.442695, %v297_v37 }
 0x130   : > { %501 = vpow2.f32 %v298_v38 }
 0x136   : > { %v502_v39 = vpop.eup %501 }
 0x137   : > { %v300_v40 = vsel %vm751_vm3, %v502_v39, 0.0 }
 0x138   : > { %v301_v41 = vsel %vm242_vm0, %v300_v40, 0.0 }
 0x139   : > { %302 = vadd.xlane.f32.xlu0 %v301_v41 }
 0x1ac   : > { %v303_v42 = vpop.xlane.xlu0 %302 }
 0x1ad   : > { %503 = vrcp.f32 %v303_v42  ;;  %v315_v46 = vand.u32 2147483648, %v303_v42  ;;  %v313_v48 = vand.u32 2147483647, %v303_v42  ;;  %vm309_vm13 = vweird.f32 %v303_v42 }
 0x1af   : > { %v316_v50 = vor.u32 1.1754944e-38, %v315_v46  ;;  %vm314_vm15 = vcmp.eq.f32.partialorder %v313_v48, 8.507059e+37 }
 0x1b3   : > { %v504_v43 = vpop.eup %503 }
 0x1b4   : > { %v305_v44 = vmul.f32 %v504_v43, %v303_v42  ;;  %vm310_vm12 = vweird.f32 %v504_v43 }
 0x1b5   : > { %vm311_vm14 = vmor %vm309_vm13, %vm310_vm12 }
 0x1b6   : > { %v306_v45 = vsub.f32 1.0, %v305_v44 }
 0x1b8   : > { %v307_v47 = vmul.f32 %v504_v43, %v306_v45 }
 0x1ba   : > { %v308_v49 = vadd.f32 %v504_v43, %v307_v47 }
 0x1bc   : > { %v312_v51 = vsel %vm311_vm14, %v504_v43, %v308_v49 }
 0x1bd   : > { %v317_v52 = vsel %vm314_vm15, %v316_v50, %v312_v51 }
 0x1be   : > { %v318_v53 = vmul.f32 %v317_v52, %v300_v40 }
 0x1c0   : > { %v321_v54 = vsel %vm751_vm3, %v318_v53, %v320_v35 }
 0x1c1   : > { %322 = vst.msk [vmem:[%s218_s11] sm:$0xff] %vm242_vm0, %v321_v54 }
 0x1c2 PF: > { %p14_p3 = scmp.ge.s32.totalorder %s700_s30, 4   ;;  %s799_s12 = smov %s625_s13 }
 0x1c3   : > { %s800_s13 = smov %s629_s14  ;;  %s801_s14 = smov %s711_s6 }
 0x1c4   : > { %s802_s15 = smov %s700_s30  ;;  %16 = sbr.rel (!%p14_p3) target bundleno = 4 (0x4), region = 80 }
 0x1c9   :  { %342 = vsyncpa [#allocation3], 1 }
 0x1ca   :  { %344 = vsyncpa [#allocation3 + $0x1], 1 }
 0x1cb   :  { %345 = vsyncpa [#allocation5], 1 }

</bundles_post_ra>
